<compile_context>
chip_gen: v7x
topology: tpu7x:2x2x1
jax: 0.10.0
libtpu: 0.0.40
codegen_flags: <defaults>
</compile_context>

<pallas_src>
import functools

import jax
import jax.numpy as jnp
from jax.experimental import pallas as pl
from jax.experimental.pallas import tpu as pltpu


# ----------------------------------------------------------------------------
# encode_box_info: pure per-box arithmetic (tiny (N,9) tensor, plain JAX).
# ----------------------------------------------------------------------------
def encode_box_info(boxes, img_wh):
    """boxes: (N, 4) xyxy; img_wh: (N, 2) per-proposal image (width, height)."""
    inv_w = 1.0 / img_wh[:, 0:1]
    inv_h = 1.0 / img_wh[:, 1:2]
    wh = boxes[:, 2:4] - boxes[:, 0:2] + 1.0
    xy = boxes[:, 0:2] + 0.5 * wh
    w, h = wh[:, 0:1], wh[:, 1:2]
    x, y = xy[:, 0:1], xy[:, 1:2]
    x1, y1, x2, y2 = boxes[:, 0:1], boxes[:, 1:2], boxes[:, 2:3], boxes[:, 3:4]
    return jnp.concatenate(
        [w * inv_w, h * inv_h, x * inv_w, y * inv_h,
         x1 * inv_w, y1 * inv_h, x2 * inv_w, y2 * inv_h,
         (w * h) * (inv_w * inv_h)],
        axis=-1,
    ).astype(jnp.float32)


# ----------------------------------------------------------------------------
# BatchNorm prepass + algebraic fold (training-mode BN, eps=1e-5, biased var).
#   h  = box_info @ W1 + b1
#   hn = (h - mean) * gamma * rsqrt(var + eps) + beta
#   y  = hn @ W2 + b2
#      = box_info @ [(W1 * scale) @ W2] + [((b1 - mean) * scale + beta) @ W2 + b2]
# so the tiled per-row kernel only needs one (N,9)@(9,128) matmul.
# NOTE: uses training-mode batch statistics over the (unpadded) rows; if the
#       real model runs in eval mode, substitute running_mean / running_var.
# ----------------------------------------------------------------------------
def fold_pos_embed_bn(box_info, w1, b1, gamma, beta, w2, b2, eps=1e-5):
    h = box_info @ w1 + b1                               # (N, 32)
    mean = jnp.mean(h, axis=0)                           # (32,)  batch stats
    var = jnp.mean(jnp.square(h - mean), axis=0)         # biased batch variance
    scale = gamma * jax.lax.rsqrt(var + eps)             # (32,)
    w_fold = (w1 * scale[None, :]) @ w2                  # (9, 128)
    b_fold = ((b1 - mean) * scale + beta) @ w2 + b2      # (128,)
    return w_fold, b_fold.reshape(1, -1)


# ----------------------------------------------------------------------------
# Fused, N-tiled kernel.  Per row-tile:
#   out[:, :in_dim]           = x            (pure passthrough, lane-dense)
#   out[:, in_dim:in_dim+e]   = softmax(logits) @ W_embed
#   out[:, in_dim+e:]         = ReLU(box_info @ W_fold + b_fold)
# The two tiny matmuls execute entirely under the shadow of the x DMA stream.
# ----------------------------------------------------------------------------
def _fused_feats_kernel(x_ref, logits_ref, box_ref, w_embed_ref, w_fold_ref,
                        b_fold_ref, out_ref):
    in_dim = x_ref.shape[1]
    e = w_embed_ref.shape[1]

    # x passthrough: single wide lane-dense slab store (dominant HBM stream).
    out_ref[:, :in_dim] = x_ref[...].astype(out_ref.dtype)

    # obj_embed = softmax(predict_logits, -1) @ obj_embed1.weight (exact divide)
    logits = logits_ref[...]
    m = jnp.max(logits, axis=-1, keepdims=True)
    ex = jnp.exp(logits - m)
    p = ex / jnp.sum(ex, axis=-1, keepdims=True)
    obj_embed = jnp.dot(p, w_embed_ref[...], preferred_element_type=jnp.float32)
    out_ref[:, in_dim:in_dim + e] = obj_embed.astype(out_ref.dtype)

    # pos_embed = ReLU(box_info @ W_fold + b_fold)   (BN folded in prepass)
    pos = jnp.dot(box_ref[...], w_fold_ref[...],
                  preferred_element_type=jnp.float32)
    pos = jnp.maximum(pos + b_fold_ref[...], 0.0)
    out_ref[:, in_dim + e:] = pos.astype(out_ref.dtype)


def _round_up(v, m):
    return ((v + m - 1) // m) * m


# ----------------------------------------------------------------------------
# Wrapper reproducing FasterRCNNFeats.forward (obj_pre_rep branch)
# ----------------------------------------------------------------------------
@functools.partial(jax.jit, static_argnames=("block_n", "out_dtype"))
def faster_rcnn_feats_forward(x, predict_logits, boxes, img_wh, params, *,
                              block_n=None, out_dtype=None):
    n, in_dim = x.shape
    c = predict_logits.shape[1]
    e = params["obj_embed_w"].shape[1]
    pos_dim = params["pos_w2"].shape[1]
    out_dim = in_dim + e + pos_dim
    out_dtype = x.dtype if out_dtype is None else out_dtype

    # Tiny prepass (plain JAX): box geometry + global BN batch stats + fold.
    box_info = encode_box_info(boxes, img_wh)
    w_fold, b_fold = fold_pos_embed_bn(
        box_info,
        params["pos_w1"], params["pos_b1"],
        params["pos_gamma"], params["pos_beta"],
        params["pos_w2"], params["pos_b2"])

    # --- generation-aware tile / VMEM budgeting ------------------------------
    # 128 MiB VMEM parts (v5e/v6e): tiles up to 1024 rows, 96 MiB scoped limit.
    #  64 MiB VMEM parts (v7x)    : tiles up to  512 rows, 48 MiB scoped limit.
    try:
        hw_vmem = getattr(pltpu.get_tpu_info(), "vmem_capacity_bytes",
                          64 * 1024 * 1024)
    except Exception:  # non-TPU / interpret fallback: be conservative
        hw_vmem = 64 * 1024 * 1024
    if hw_vmem >= 96 * 1024 * 1024:
        tile_cap, vmem_limit = 1024, 96 * 1024 * 1024
    else:
        tile_cap, vmem_limit = 512, 48 * 1024 * 1024
    if block_n is not None:
        tile_cap = min(tile_cap, int(block_n))
    tile_cap = max(8, _round_up(tile_cap, 8))

    num_blocks = pl.cdiv(n, tile_cap)
    if num_blocks < 2 and n >= 512:
        # Keep the 1-D grid >= 2 steps so both v7x TensorCores stream DMAs.
        num_blocks = 2
    tile_n = max(8, _round_up(pl.cdiv(n, num_blocks), 8))
    grid = (pl.cdiv(n, tile_n),)
    # No jnp.pad of x: Pallas handles the partial last block (row-independent
    # math; out-of-bounds rows of the final block are simply not written back).

    out = pl.pallas_call(
        _fused_feats_kernel,
        out_shape=jax.ShapeDtypeStruct((n, out_dim), out_dtype),
        grid=grid,
        in_specs=[
            pl.BlockSpec((tile_n, in_dim), lambda i: (i, 0)),   # x (passthrough)
            pl.BlockSpec((tile_n, c), lambda i: (i, 0)),        # predict_logits
            pl.BlockSpec((tile_n, 9), lambda i: (i, 0)),        # box_info
            pl.BlockSpec((c, e), lambda i: (0, 0)),             # obj_embed weight
            pl.BlockSpec((9, pos_dim), lambda i: (0, 0)),       # folded W
            pl.BlockSpec((1, pos_dim), lambda i: (0, 0)),       # folded b
        ],
        out_specs=pl.BlockSpec((tile_n, out_dim), lambda i: (i, 0)),
        compiler_params=pltpu.CompilerParams(
            # Row tiles are independent -> shard across both TCs on v7x.
            dimension_semantics=("parallel",),
            vmem_limit_bytes=vmem_limit,
        ),
    )(x, predict_logits, box_info, params["obj_embed_w"], w_fold, b_fold)

    # TODO(synk): obj_dists / obj_ctx come from myLSTMContext (external module +
    #             checkpoint); only obj_pre_rep is returned.
    return out


# ----------------------------------------------------------------------------
# Pure-JAX reference (for the correctness check in the demo)
# ----------------------------------------------------------------------------
def _reference_forward(x, predict_logits, boxes, img_wh, params):
    p = jax.nn.softmax(predict_logits, axis=-1)
    obj_embed = p @ params["obj_embed_w"]
    bi = encode_box_info(boxes, img_wh)
    h = bi @ params["pos_w1"] + params["pos_b1"]
    mean = jnp.mean(h, axis=0)
    var = jnp.mean(jnp.square(h - mean), axis=0)
    hn = (h - mean) * jax.lax.rsqrt(var + 1e-5)
    hn = hn * params["pos_gamma"] + params["pos_beta"]
    pos = jnp.maximum(hn @ params["pos_w2"] + params["pos_b2"], 0.0)
    return jnp.concatenate([x, obj_embed, pos], axis=-1)


if __name__ == "__main__":
    key = jax.random.PRNGKey(0)

    # Small, module-consistent shapes.
    num_images = 2
    props_per_img = 8
    N = num_images * props_per_img          # total proposals
    in_dim = 64                             # ROI feature dim (stand-in for 4096)
    num_obj_classes = 11                    # len(obj_classes)
    embed_dim = 32                          # cfg.MODEL.ROI_RELATION_HEAD.EMBED_DIM
    img_w, img_h = 32.0, 32.0

    ks = jax.random.split(key, 10)

    # ROI features and per-proposal predicted logits (detach()'d in reference).
    x = jax.random.normal(ks[0], (N, in_dim), dtype=jnp.float32)
    predict_logits = jax.random.normal(ks[1], (N, num_obj_classes),
                                       dtype=jnp.float32)

    # Boxes in xyxy, guaranteed x2 > x1, y2 > y1; per-proposal image size.
    xy1 = jax.random.uniform(ks[2], (N, 2), minval=0.0, maxval=img_w * 0.5)
    wh = jax.random.uniform(ks[3], (N, 2), minval=1.0, maxval=img_w * 0.45)
    boxes = jnp.concatenate([xy1, xy1 + wh], axis=-1).astype(jnp.float32)
    img_wh = jnp.tile(jnp.array([[img_w, img_h]], jnp.float32), (N, 1))

    # Deterministic synthetic parameters.
    params = {
        # obj_embed1.weight (stand-in for GloVe vectors): (num_obj_classes, embed_dim)
        "obj_embed_w": 0.1 * jax.random.normal(
            ks[4], (num_obj_classes, embed_dim), dtype=jnp.float32),
        # pos_embed: Linear(9,32) -> BatchNorm1d(32) -> Linear(32,128) -> ReLU
        "pos_w1": 0.2 * jax.random.normal(ks[5], (9, 32), dtype=jnp.float32),
        "pos_b1": 0.05 * jax.random.normal(ks[6], (32,), dtype=jnp.float32),
        "pos_gamma": jnp.ones((32,), jnp.float32),
        "pos_beta": jnp.zeros((32,), jnp.float32),
        "pos_w2": 0.1 * jax.random.normal(ks[7], (32, 128), dtype=jnp.float32),
        "pos_b2": 0.05 * jax.random.normal(ks[8], (128,), dtype=jnp.float32),
    }

    # block_n=8 so the demo exercises a multi-tile grid (grid=(2,)).
    obj_pre_rep = faster_rcnn_feats_forward(
        x, predict_logits, boxes, img_wh, params, block_n=8)
    obj_pre_rep = jax.block_until_ready(obj_pre_rep)

    assert obj_pre_rep.shape == (N, in_dim + embed_dim + 128), obj_pre_rep.shape
    assert obj_pre_rep.dtype == jnp.float32

    ref = _reference_forward(x, predict_logits, boxes, img_wh, params)
    assert jnp.allclose(obj_pre_rep, ref, atol=1e-4, rtol=1e-4), (
        float(jnp.max(jnp.abs(obj_pre_rep - ref))))

    print("KERNEL_OK")
</pallas_src>

<mosaic_0001>
module attributes {stable_mosaic.version = 11 : i64} {
  func.func @_fused_feats_kernel(%arg0: i32, %arg1: memref<8x64xf32, #tpu.memory_space<vmem>>, %arg2: memref<8x11xf32, #tpu.memory_space<vmem>>, %arg3: memref<8x9xf32, #tpu.memory_space<vmem>>, %arg4: memref<11x32xf32, #tpu.memory_space<vmem>>, %arg5: memref<9x128xf32, #tpu.memory_space<vmem>>, %arg6: memref<1x128xf32, #tpu.memory_space<vmem>>, %arg7: memref<8x224xf32, #tpu.memory_space<vmem>>) attributes {dimension_semantics = [#tpu.dimension_semantics<parallel>], iteration_bounds = array<i64: 2>, scalar_prefetch = 0 : i64, scratch_operands = 0 : i64, tpu.core_type = #tpu.core_type<tc>, window_params = [{transform_indices = @transform_0, window_bounds = array<i64: 8, 64>}, {transform_indices = @transform_1, window_bounds = array<i64: 8, 11>}, {transform_indices = @transform_2, window_bounds = array<i64: 8, 9>}, {pipeline_mode = #tpu.pipeline_mode<synchronous>, transform_indices = @transform_3, window_bounds = array<i64: 11, 32>}, {pipeline_mode = #tpu.pipeline_mode<synchronous>, transform_indices = @transform_4, window_bounds = array<i64: 9, 128>}, {pipeline_mode = #tpu.pipeline_mode<synchronous>, transform_indices = @transform_5, window_bounds = array<i64: 1, 128>}, {transform_indices = @transform_6, window_bounds = array<i64: 8, 224>}]} {
    %c0 = arith.constant 0 : index
    %c0_0 = arith.constant 0 : index
    %0 = vector.load %arg1[%c0, %c0_0] : memref<8x64xf32, #tpu.memory_space<vmem>>, vector<8x64xf32>
    %c0_1 = arith.constant 0 : index
    %c0_2 = arith.constant 0 : index
    %1 = vector.load %arg7[%c0_1, %c0_2] : memref<8x224xf32, #tpu.memory_space<vmem>>, vector<8x64xf32>
    tpu.vector_store %arg7[%c0_1, %c0_2], %0 {strides = array<i32>} : memref<8x224xf32, #tpu.memory_space<vmem>>, vector<8x64xf32>,
    %c0_3 = arith.constant 0 : index
    %c0_4 = arith.constant 0 : index
    %2 = vector.load %arg2[%c0_3, %c0_4] : memref<8x11xf32, #tpu.memory_space<vmem>>, vector<8x11xf32>
    %cst = arith.constant dense<0xFF800000> : vector<8xf32>
    %3 = vector.multi_reduction <maximumf>, %2, %cst [1] : vector<8x11xf32> to vector<8xf32>
    %4 = vector.shape_cast %3 : vector<8xf32> to vector<8x1xf32>
    %5 = vector.broadcast %4 : vector<8x1xf32> to vector<8x11xf32>
    %6 = arith.subf %2, %5 : vector<8x11xf32>
    %7 = math.exp %6 : vector<8x11xf32>
    %cst_5 = arith.constant dense<0.000000e+00> : vector<8xf32>
    %8 = vector.multi_reduction <add>, %7, %cst_5 [1] : vector<8x11xf32> to vector<8xf32>
    %9 = vector.shape_cast %8 : vector<8xf32> to vector<8x1xf32>
    %10 = vector.broadcast %9 : vector<8x1xf32> to vector<8x11xf32>
    %11 = arith.divf %7, %10 : vector<8x11xf32>
    %c0_6 = arith.constant 0 : index
    %c0_7 = arith.constant 0 : index
    %12 = vector.load %arg4[%c0_6, %c0_7] : memref<11x32xf32, #tpu.memory_space<vmem>>, vector<11x32xf32>
    %cst_8 = arith.constant dense<0.000000e+00> : vector<8x32xf32>
    %13 = tpu.matmul %11, %12, %cst_8 {dimension_numbers = #tpu.dot_dimension_numbers<[1], [0], [0], [1], [0, 0, 1, 1], [], []>} : vector<8x11xf32>, vector<11x32xf32>, vector<8x32xf32> -> vector<8x32xf32>
    %c0_9 = arith.constant 0 : index
    %c64 = arith.constant 64 : index
    %14 = vector.load %arg7[%c0_9, %c64] : memref<8x224xf32, #tpu.memory_space<vmem>>, vector<8x32xf32>
    tpu.vector_store %arg7[%c0_9, %c64], %13 {strides = array<i32>} : memref<8x224xf32, #tpu.memory_space<vmem>>, vector<8x32xf32>,
    %c0_10 = arith.constant 0 : index
    %c0_11 = arith.constant 0 : index
    %15 = vector.load %arg3[%c0_10, %c0_11] : memref<8x9xf32, #tpu.memory_space<vmem>>, vector<8x9xf32>
    %c0_12 = arith.constant 0 : index
    %c0_13 = arith.constant 0 : index
    %16 = vector.load %arg5[%c0_12, %c0_13] : memref<9x128xf32, #tpu.memory_space<vmem>>, vector<9x128xf32>
    %cst_14 = arith.constant dense<0.000000e+00> : vector<8x128xf32>
    %17 = tpu.matmul %15, %16, %cst_14 {dimension_numbers = #tpu.dot_dimension_numbers<[1], [0], [0], [1], [0, 0, 1, 1], [], []>} : vector<8x9xf32>, vector<9x128xf32>, vector<8x128xf32> -> vector<8x128xf32>
    %c0_15 = arith.constant 0 : index
    %c0_16 = arith.constant 0 : index
    %18 = vector.load %arg6[%c0_15, %c0_16] : memref<1x128xf32, #tpu.memory_space<vmem>>, vector<1x128xf32>
    %19 = vector.broadcast %18 : vector<1x128xf32> to vector<8x128xf32>
    %20 = arith.addf %17, %19 : vector<8x128xf32>
    %cst_17 = arith.constant 0.000000e+00 : f32
    %21 = vector.broadcast %cst_17 : f32 to vector<8x128xf32>
    %22 = arith.maximumf %20, %21 : vector<8x128xf32>
    %c0_18 = arith.constant 0 : index
    %c96 = arith.constant 96 : index
    %23 = vector.load %arg7[%c0_18, %c96] : memref<8x224xf32, #tpu.memory_space<vmem>>, vector<8x128xf32>
    tpu.vector_store %arg7[%c0_18, %c96], %22 {strides = array<i32>} : memref<8x224xf32, #tpu.memory_space<vmem>>, vector<8x128xf32>,
    return
  }
  func.func @transform_0(%arg0: i32) -> (i32, i32) {
    %c0_i32 = arith.constant 0 : i32
    %c0_i32_0 = arith.constant 0 : i32
    return %arg0, %c0_i32 : i32, i32
  }
  func.func @transform_1(%arg0: i32) -> (i32, i32) {
    %c0_i32 = arith.constant 0 : i32
    %c0_i32_0 = arith.constant 0 : i32
    return %arg0, %c0_i32 : i32, i32
  }
  func.func @transform_2(%arg0: i32) -> (i32, i32) {
    %c0_i32 = arith.constant 0 : i32
    %c0_i32_0 = arith.constant 0 : i32
    return %arg0, %c0_i32 : i32, i32
  }
  func.func @transform_3(%arg0: i32) -> (i32, i32) {
    %c0_i32 = arith.constant 0 : i32
    %c0_i32_0 = arith.constant 0 : i32
    %c0_i32_1 = arith.constant 0 : i32
    return %c0_i32, %c0_i32_0 : i32, i32
  }
  func.func @transform_4(%arg0: i32) -> (i32, i32) {
    %c0_i32 = arith.constant 0 : i32
    %c0_i32_0 = arith.constant 0 : i32
    %c0_i32_1 = arith.constant 0 : i32
    return %c0_i32, %c0_i32_0 : i32, i32
  }
  func.func @transform_5(%arg0: i32) -> (i32, i32) {
    %c0_i32 = arith.constant 0 : i32
    %c0_i32_0 = arith.constant 0 : i32
    %c0_i32_1 = arith.constant 0 : i32
    return %c0_i32, %c0_i32_0 : i32, i32
  }
  func.func @transform_6(%arg0: i32) -> (i32, i32) {
    %c0_i32 = arith.constant 0 : i32
    %c0_i32_0 = arith.constant 0 : i32
    return %arg0, %c0_i32 : i32, i32
  }
}

</mosaic_0001>

<bundles_post_ra>
// kernel: faster_rcnn_feats_forward.1
= control target key start
LH: loop header
LB: loop body
LE: loop exit
PB: predicated region body
PF: predicated region fallthrough
CT: control target
= control target key end

     0   :  { %11 = vsyncpa [#allocation3], 0  ;;  %s908_s0 = inlined_call_operand.vmem [shape: f32[16,64], index: 0, kind: input, shape index: {}]   ;;  %s909_s1 = inlined_call_operand.vmem [shape: f32[16,11], index: 1, kind: input, shape index: {}]   ;;  %s910_s2 = inlined_call_operand.vmem [shape: f32[16,9], index: 2, kind: input, shape index: {}]   ;;  %s911_s3 = inlined_call_operand.vmem [shape: f32[11,32], index: 3, kind: input, shape index: {}]   ;;  %s912_s4 = inlined_call_operand.vmem [shape: f32[9,128], index: 4, kind: input, shape index: {}]   ;;  %s913_s5 = inlined_call_operand.vmem [shape: f32[1,128], index: 5, kind: input, shape index: {}]   ;;  %s914_s6 = inlined_call_operand.hbm [shape: f32[16,224], index: 6, kind: output, shape index: {}]  }
   0x1   :  { %13 = vsyncpa [#allocation3 + $0x1], 0  ;;  %s779_s21 = smov 0   ;;  %s781_s22 = smov 0  }
   0x2   :  { %s783_s23 = smov 0   ;;  %s785_s24 = smov 0  }
   0x3 LB: > { %s800_s25 = sadd.s32 4294967295, %s735_s24   ;;  %s577_s26 = sadd.s32 4294967294, %s735_s24   ;;  %s735_s24 = sphi %s785_s24, %s920_s24   ;;  %s731_s23 = sphi %s783_s23, %s919_s23   ;;  %s727_s22 = sphi %s781_s22, %s918_s22   ;;  %s723_s21 = sphi %s779_s21, %s917_s21  }
   0x4   : > { %s804_s27 = sadd.s32 1, %s735_s24   ;;  %s167_s28 = sadd.s32 1, %s731_s23 }
   0x5   : > { %s164_s29 = ssub.s32 %s735_s24, %s804_s27  ;;  %p177_p0 = scmp.ne.s32.totalorder %s731_s23, %s727_s22 }
   0x6   : > { %p165_p1 = scmp.eq.s32.totalorder %s164_s29, 0  ;;  %p178_p2 = scmp.eq.s32.totalorder %s800_s25, 1 }
   0x7   : > { %p183_p3 = scmp.ne.s32.totalorder %s727_s22, %s723_s21  ;;  %p184_p4 = scmp.eq.s32.totalorder %s577_s26, 1 }
   0x8   : > { %s815_s30 = scalar_select %p165_p1, %s731_s23, %s167_s28  }
   0x9   : > { %p817_p5 = por %p178_p2, %p177_p0  ;;  %p821_p6 = por %p184_p4, %p183_p3 }
   0xa   : > { %p580_p7 = scmp.ge.s32.totalorder %s735_s24, 1  ;;  %p232_p8 = scmp.lt.s32.totalorder %s735_s24, 3 }
   0xc   : > { %p233_p9 = pnand %p580_p7, %p232_p8 }
   0xd   : > { %p269_p10 = scmp.lt.s32.totalorder (!%p233_p9), %s800_s25, 1  ;;  %vm285_vm0 = vcmask (!%p233_p9), 89088   ;;  %v383_v7 = vld [vmem:[%s912_s4] sm:$0xff] (!%p233_p9)  ;;  %v384_v8 = vld [vmem:[%s912_s4 + $0x8] sm:$0x1] (!%p233_p9)  ;;  %vm396_vm1 = vcmask (!%p233_p9), 1040384  }
   0xe   : > { %236 = sbr.rel (%p233_p9) target bundleno = 686 (0x2ae), region = 44  ;;  %v737_v9 = vmov (!%p233_p9), 0.0|0.0   ;;  %v621_v10 = vpack.c.bf16 (!%p233_p9), %v384_v8, %v383_v7  ;;  %vm738_vm2 = vmmov (!%p233_p9), 1   ;;  %v297_v11 = vld [vmem:[%s911_s3] sm:$0xff] (!%p233_p9)  ;;  %v298_v12 = vld [vmem:[%s911_s3 + $0x8] sm:$0x7] (!%p233_p9) }
   0xf   : > { %620 = vmatprep.subr.bf16.mxu1 (!%p233_p9), %v737_v9  ;;  %616 = vmatprep.subr.bf16.mxu0 (!%p233_p9), %v737_v9  ;;  %vm622_vm3 = vmpackc.low (!%p233_p9), %vm396_vm1, %vm738_vm2  ;;  %vm302_vm4 = vcmask (!%p233_p9), 1042432   ;;  %v617_v13 = vpack.c.bf16 (!%p233_p9), %v298_v12, %v297_v11  ;;  %vm739_vm6 = vmmov (!%p233_p9), 0   ;;  %v740_v14 = vmov (!%p233_p9), 0.0   ;;  %s266_s14 = sand.u32 (!%p233_p9), 1, %s727_s22   ;;  %v587_v22 = vld [vmem:[%s913_s5] ss:$0 sm:$0xff] (!%p233_p9) }
  0x10   : > { %vm618_vm5 = vmpackc.low (!%p233_p9), %vm302_vm4, %vm738_vm2  ;;  %613 = vmatprep.mubr.msk.f32.mxu1 (!%p233_p9), %vm739_vm6, %v740_v14  ;;  %606 = vmatprep.mubr.msk.f32.mxu0 (!%p233_p9), %vm739_vm6, %v740_v14  ;;  %vm392_vm7 = vcmask (!%p233_p9), 72704   ;;  %vm282_vm8 = vcmask (!%p233_p9), 523264   ;;  %s581_s15 = sshll.u32 (!%p233_p9), %s266_s14, 4  ;;  %s741_s19 = smov (!%p233_p9), 64   ;;  %vm380_vm9 = vcmask (!%p233_p9), 785920   ;;  %vm475_vm10 = vcmask (!%p233_p9), 1048320  }
  0x11   : > { %623 = vmatpush3.bf16.msk.msra.mxu1 (!%p233_p9), %vm622_vm3, %v621_v10  ;;  %619 = vmatpush3.bf16.msk.msra.mxu0 (!%p233_p9), %vm618_vm5, %v617_v13  ;;  %s268_s16 = scalar_lea.vmem (!%p233_p9), [#allocation2], %s581_s15  ;;  %vm477_vm11 = vcmask (!%p233_p9), 785408   ;;  %s480_s11 = scalar_lea.sflag (!%p233_p9), [#allocation3], %s266_s14 }
  0x12   : > { %s494_s26 = sshll.u32 (!%p233_p9), %s268_s16, 4  ;;  %s868_s26 = int_to_ptr.vmem [resolvable:$true] %s494_s26 }
  0x13   : > { %s673_s12 = scalar_lea.vmem (!%p233_p9), %s868_s26, 256 }
  0x14   : > { %p674_p11 = scmp.ne.s32.totalorder (!%p233_p9), %s868_s26, %s673_s12 }
  0x15   : > { %s270_s9 = scalar_select %p269_p10, %s800_s25, 1 }
  0x16   : > { %p675_p12 = pnand %p674_p11, %p817_p5 }
  0x17   : > { %s829_s10 = sshll.u32 %s270_s9, 3 }
  0x18   : > { %s276_s13 = scalar_lea.vmem %s909_s1, %s829_s10  ;;  %s280_s20 = scalar_lea.vmem %s910_s2, %s829_s10 }
  0x19   : > { %v284_v0 = vld [vmem:[%s276_s13] sm:$0xff]  ;;  %s272_s13 = scalar_lea.vmem %s908_s0, %s829_s10  ;;  %s595_s10 = sshll.u32 %s800_s25, 8 }
  0x1a   : > { %v286_v1 = vsel %vm285_vm0, %v284_v0, -inf  ;;  %v382_v15 = vld [vmem:[%s280_s20] sm:$0xff]  ;;  %s742_s20 = smov 96   ;;  %s866_s9 = scalar_lea.hbm %s914_s6, %s595_s10 }
  0x1b   : > { %287 = vmax.xlane.f32.xlu0 %v286_v1  ;;  %614 = vmatmul.mubr.msk.f32.vlgmr.msra.gmra.mrb[0].mxu1 %vm392_vm7, %v382_v15  ;;  %v281_v21 = vld [vmem:[%s272_s13] sm:$0xff]  ;;  %p676_p13 = pneg %p675_p12  ;;  %s743_s25 = smov [#allocation2]  }
  0x1c   : > { %283 = vst.msk [vmem:[%s268_s16] sm:$0xff] %vm282_vm8, %v281_v21  ;;  %s677_s13 = sshll.u32 %s743_s25, 4  ;;  %s678_s13 = int_to_ptr.vmem [resolvable:$false] %s677_s13 }
  0x1d   : > { %s679_s15 = scalar_lea.vmem %s678_s13, 512  ;;  %p680_p0 = scmp.lt.s32.totalorder %s868_s26, %s678_s13 }
  0x1e   : > { %p681_p1 = scmp.lt.s32.totalorder %s679_s15, %s673_s12 }
  0x20   : > { %p682_p2 = por %p681_p1, %p680_p0 }
  0x22   : > { %p683_p3 = pnand %p682_p2, %p676_p13 }
  0xa8   : > { %v288_v2 = vpop.xlane.xlu0 %287 }
  0xa9   : > { %v289_v3 = vsub.f32 %v284_v0, %v288_v2 }
  0xab   : > { %v290_v4 = vmul.f32 1.442695, %v289_v3 }
  0xad   : > { %669 = vpow2.f32 %v290_v4 }
  0xb7   : > { %v670_v5 = vpop.eup %669 }
  0xb8   : > { %v292_v6 = vsel %vm285_vm0, %v670_v5, 0.0 }
  0xb9   : > { %293 = vadd.xlane.f32.xlu0 %v292_v6 }
  0xee   : > { %v466_v19 = vpop.f32.mrb[0].mxu1 }
  0xef   : > { %v615_v20 = vpop.f32.mrb[1].mxu1  ;;  %v467_v23 = vadd.f32 %v587_v22, %v466_v19 }
  0xf1   : > { %v470_v25 = vmax.f32 %v467_v23, 0.0 }
 0x146   : > { %v294_v16 = vpop.xlane.xlu0 %293 }
 0x147   : > { %671 = vrcp.f32 %v294_v16 }
 0x151   : > { %v672_v17 = vpop.eup %671 }
 0x152   : > { %v296_v18 = vmul.f32 %v672_v17, %v670_v5 }
 0x154   : > { %607 = vmatmul.mubr.msk.f32.vlgmr.msra.gmra.mrb[0].mxu0 %vm285_vm0, %v296_v18 }
 0x227   : > { %v372_v24 = vpop.f32.mrb[0].mxu0 }
 0x228   : > { %377 = vrot.lane.b32.xlu1 %v372_v24, %s741_s19  ;;  %v608_v26 = vpop.f32.mrb[1].mxu0 }
 0x22c   : > { %472 = vrot.lane.b32.xlu1 %v470_v25, %s742_s20 }
 0x29a   : > { %v378_v27 = vpop.permute.xlu1 %377 }
 0x29b   : > { %381 = vst.msk [vmem:[%s268_s16] sm:$0xff] %vm380_vm9, %v378_v27 }
 0x29e   : > { %v473_v28 = vpop.permute.xlu1 %472 }
 0x29f   : > { %476 = vst.msk [vmem:[%s268_s16] sm:$0xff] %vm475_vm10, %v473_v28 }
 0x2a0   : > { %478 = vst.msk [vmem:[%s268_s16 + $0x8] sm:$0xff] %vm477_vm11, %v473_v28 }
 0x2a1   : > { %686 = shalt.err (!%p683_p3)
}
 0x2a2   : > { %s687_s14 = scalar_lea.hbm %s866_s9, 256  ;;  %s691_s18 = scalar_lea.hbm %s914_s6, 512 }
 0x2a3   : > { %p688_p4 = scmp.ne.s32.totalorder %s866_s9, %s687_s14  ;;  %p692_p9 = scmp.lt.u32.totalorder %s866_s9, %s914_s6 }
 0x2a4   : > { %p693_p10 = scmp.lt.u32.totalorder %s691_s18, %s687_s14  ;;  %p695_p12 = scmp.lt.u32.totalorder %s687_s14, %s866_s9 }
 0x2a5   : > { %p689_p7 = pnand %p688_p4, %p817_p5 }
 0x2a6   : > { %p694_p11 = por %p693_p10, %p692_p9 }
 0x2a7   : > { %p690_p8 = pneg %p689_p7 }
 0x2a8   : > { %p696_p13 = por %p695_p12, %p694_p11 }
 0x2aa   : > { %p697_p0 = pnand %p696_p13, %p690_p8 }
 0x2ac   : > { %700 = shalt.err (!%p697_p0)
}
 0x2ad   : > { %624 = dma.vmem_to_hbm [thread:$0]  (%p817_p5), %s868_s26, 256, %s866_s9, %s480_s11  }
 0x2ae PF: > { %p630_p1 = scmp.ge.s32.totalorder %s735_s24, 2  ;;  %s506_s10 = sand.u32 1, %s723_s21  }
 0x2af   : > { %s507_s28 = scalar_lea.sflag [#allocation3], %s506_s10 }
 0x2b0   : > { %p627_p2 = pnand %p630_p1, %p821_p6 }
 0x2b2   : > { %718 = dma.done.wait (!%p627_p2), %s507_s28, 256  }
 0x2b3   : > { %720 = vsyncadd (!%p627_p2), %s507_s28, 4294967040  ;;  %p16_p3 = scmp.ge.s32.totalorder %s804_s27, 4   ;;  %s917_s21 = smov %s727_s22 }
 0x2b4   : > { %s918_s22 = smov %s731_s23  ;;  %s919_s23 = smov %s815_s30 }
 0x2b5   : > { %s920_s24 = smov %s804_s27  ;;  %18 = sbr.rel (!%p16_p3) target bundleno = 3 (0x3), region = 85 }
 0x2bc   :  { %512 = vsyncpa [#allocation3], 1 }
 0x2bd   :  { %514 = vsyncpa [#allocation3 + $0x1], 1 }

</bundles_post_ra>
